<compile_context>
chip_gen: v6e
topology: v6e:2x2x1
jax: 0.10.0
libtpu: 0.0.40
codegen_flags: <defaults>
</compile_context>

<pallas_src>
import functools
import math

import jax
import jax.numpy as jnp
from jax.experimental import pallas as pl
from jax.experimental.pallas import tpu as pltpu


# ----------------------------------------------------------------------------
# helpers
# ----------------------------------------------------------------------------
def _round_up(x, m):
    return ((x + m - 1) // m) * m


def _pick_tile(size, target, granules):
    """Largest divisor of `size` that is <= target and a multiple of one of
    `granules` (tried in preference order).  Wrappers pad `size` to a multiple
    of the smallest granule first, so this never silently falls back to a huge
    monolithic block."""
    if size <= target:
        return size
    for g in granules:
        best = None
        t = g
        while t <= target:
            if size % t == 0:
                best = t
            t += g
        if best is not None:
            return best
    return size  # unreachable after padding; kept as a safe fallback


def _heads_per_block(heads, dim_head):
    """Smallest number of heads whose concatenated width is 128-lane aligned."""
    if dim_head % 128 == 0:
        return 1
    hb = 128 // math.gcd(dim_head, 128)
    # TODO(synk): support head counts not divisible by the lane-alignment factor.
    assert heads % hb == 0, f"heads ({heads}) must be a multiple of {hb}"
    return hb


# ----------------------------------------------------------------------------
# Tiled linear kernel: y = x @ w.T (+ bias), PyTorch nn.Linear semantics.
# bf16 operands on the MXU, f32 VMEM accumulator, reduction axis last.
# ----------------------------------------------------------------------------
def _linear_kernel(x_ref, w_ref, o_ref, acc_ref):
    @pl.when(pl.program_id(2) == 0)
    def _init():
        acc_ref[...] = jnp.zeros(acc_ref.shape, dtype=acc_ref.dtype)

    acc_ref[...] += jax.lax.dot_general(
        x_ref[...], w_ref[...],
        dimension_numbers=(((1,), (1,)), ((), ())),   # contract K on both sides
        preferred_element_type=jnp.float32,
    )

    @pl.when(pl.program_id(2) == pl.num_programs(2) - 1)
    def _finalize():
        o_ref[...] = acc_ref[...].astype(o_ref.dtype)


def _linear_bias_kernel(x_ref, w_ref, b_ref, o_ref, acc_ref):
    @pl.when(pl.program_id(2) == 0)
    def _init():
        acc_ref[...] = jnp.zeros(acc_ref.shape, dtype=acc_ref.dtype)

    acc_ref[...] += jax.lax.dot_general(
        x_ref[...], w_ref[...],
        dimension_numbers=(((1,), (1,)), ((), ())),
        preferred_element_type=jnp.float32,
    )

    @pl.when(pl.program_id(2) == pl.num_programs(2) - 1)
    def _finalize():
        o_ref[...] = (acc_ref[...] + b_ref[...]).astype(o_ref.dtype)


def pallas_linear(x, w, bias=None, *, out_dtype=None,
                  tm_target=512, tn_target=512, tk_target=512):
    """x: [M, K], w: [N, K] (PyTorch layout), bias: optional [N] (f32) -> [M, N]."""
    if out_dtype is None:
        out_dtype = x.dtype
    M, K = x.shape
    N, K2 = w.shape
    assert K == K2

    # Pad to (8, 128) granules: keeps BlockSpecs legal, keeps output stores
    # lane-dense, and guarantees _pick_tile always finds a bounded tile.
    Mp, Np, Kp = _round_up(M, 8), _round_up(N, 128), _round_up(K, 128)
    if (Mp, Kp) != (M, K):
        x = jnp.pad(x, ((0, Mp - M), (0, Kp - K)))
    if (Np, Kp) != (N, K):
        w = jnp.pad(w, ((0, Np - N), (0, Kp - K)))
    if bias is not None and Np != N:
        bias = jnp.pad(bias, (0, Np - N))

    tm = _pick_tile(Mp, tm_target, (8,))
    tn = _pick_tile(Np, tn_target, (256, 128))   # prefer 256-aligned MXU tiles
    tk = _pick_tile(Kp, tk_target, (256, 128))
    grid = (Mp // tm, Np // tn, Kp // tk)        # reduction axis last

    itemsize = jnp.dtype(x.dtype).itemsize
    cost = pl.CostEstimate(
        flops=2 * Mp * Np * Kp,
        transcendentals=0,
        bytes_accessed=(Mp * Kp + Np * Kp) * itemsize
        + Mp * Np * jnp.dtype(out_dtype).itemsize
        + (Np * 4 if bias is not None else 0),
    )
    compiler_params = pltpu.CompilerParams(
        dimension_semantics=("parallel", "parallel", "arbitrary"),
        vmem_limit_bytes=32 * 1024 * 1024,   # tiles are ~4 MiB incl. double buffers
    )

    in_specs = [
        pl.BlockSpec((tm, tk), lambda i, j, k: (i, k)),
        pl.BlockSpec((tn, tk), lambda i, j, k: (j, k)),
    ]
    args = [x, w]
    kernel = _linear_kernel
    if bias is not None:
        in_specs.append(pl.BlockSpec((1, tn), lambda i, j, k: (0, j)))
        args.append(bias.reshape(1, Np))
        kernel = _linear_bias_kernel

    y = pl.pallas_call(
        kernel,
        out_shape=jax.ShapeDtypeStruct((Mp, Np), out_dtype),
        grid=grid,
        in_specs=in_specs,
        out_specs=pl.BlockSpec((tm, tn), lambda i, j, k: (i, j)),
        scratch_shapes=[pltpu.VMEM((tm, tn), jnp.float32)],
        compiler_params=compiler_params,
        cost_estimate=cost,
    )(*args)

    if (Mp, Np) != (M, N):
        y = y[:M, :N]
    return y


# ----------------------------------------------------------------------------
# Flash-style attention core.
# Grid = (batch, head_pairs, q_tiles, kv_tiles); Q/K/V are read straight out of
# the fused [b, n, 3*inner] QKV activation via index_maps (no wrapper splits /
# transposes).  128-lane head-pair slabs, online softmax over the KV axis.
# ----------------------------------------------------------------------------
def _flash_attn_kernel(q_ref, k_ref, v_ref, o_ref, m_sc, l_sc, acc_sc, *,
                       heads_per_block, dim_head, scale):
    ki = pl.program_id(3)
    d = dim_head

    @pl.when(ki == 0)
    def _init():
        m_sc[...] = jnp.full(m_sc.shape, -jnp.inf, dtype=m_sc.dtype)
        l_sc[...] = jnp.zeros(l_sc.shape, dtype=l_sc.dtype)
        acc_sc[...] = jnp.zeros(acc_sc.shape, dtype=acc_sc.dtype)

    for h in range(heads_per_block):                  # tiny unroll (e.g. 2 heads)
        sl = pl.ds(h * d, d)
        q = q_ref[0, :, sl]                           # (tq,  d) bf16
        k = k_ref[0, :, sl]                           # (tkv, d) bf16
        v = v_ref[0, :, sl]                           # (tkv, d) bf16

        # scores = (q @ k^T) * scale; contract d on both sides (no k.T copy)
        s = jax.lax.dot_general(
            q, k, dimension_numbers=(((1,), (1,)), ((), ())),
            preferred_element_type=jnp.float32,
        ) * scale                                     # (tq, tkv) f32

        m_prev = m_sc[h]                              # (tq, 1) f32
        l_prev = l_sc[h]
        m_new = jnp.maximum(m_prev, jnp.max(s, axis=-1, keepdims=True))
        alpha = jnp.exp(m_prev - m_new)               # EUP
        p = jnp.exp(s - m_new)                        # (tq, tkv) f32

        m_sc[h] = m_new
        l_sc[h] = alpha * l_prev + jnp.sum(p, axis=-1, keepdims=True)
        acc_sc[:, sl] = alpha * acc_sc[:, sl] + jnp.dot(
            p.astype(v.dtype), v, preferred_element_type=jnp.float32)

    @pl.when(ki == pl.num_programs(3) - 1)
    def _finalize():
        for h in range(heads_per_block):
            sl = pl.ds(h * d, d)
            inv = pl.reciprocal(l_sc[h], approx=True)      # EUP reciprocal
            acc_sc[:, sl] = acc_sc[:, sl] * inv
        # one unmasked, 128-lane-dense store per output block
        o_ref[0] = acc_sc[...].astype(o_ref.dtype)


def pallas_attention(qkv, heads, dim_head, scale, *, tq_target=256, tkv_target=512):
    """qkv: [b, n, 3*inner] -> [b, n, inner] in 'b n (h d)' (lane-dense) layout."""
    b, n, three_inner = qkv.shape
    inner = heads * dim_head
    assert three_inner == 3 * inner

    hb = _heads_per_block(heads, dim_head)    # e.g. 2 for dim_head=64 -> 128 lanes
    hbd = hb * dim_head
    n_hb = inner // hbd                       # head-blocks per Q/K/V section

    if n % 8 == 0:
        tq = _pick_tile(n, tq_target, (8,))
        tkv = _pick_tile(n, tkv_target, (8,))
    else:
        tq = tkv = n                          # full-extent fallback (see TODO above)

    grid = (b, heads // hb, n // tq, n // tkv)

    kernel = functools.partial(
        _flash_attn_kernel, heads_per_block=hb, dim_head=dim_head, scale=scale)

    itemsize = jnp.dtype(qkv.dtype).itemsize
    cost = pl.CostEstimate(
        flops=4 * b * heads * n * n * dim_head,
        transcendentals=b * heads * n * n,
        bytes_accessed=(3 * b * n * inner + b * n * inner) * itemsize,
    )

    q_spec = pl.BlockSpec((1, tq, hbd), lambda bi, hi, qi, ki: (bi, qi, hi))
    k_spec = pl.BlockSpec((1, tkv, hbd), lambda bi, hi, qi, ki: (bi, ki, n_hb + hi))
    v_spec = pl.BlockSpec((1, tkv, hbd), lambda bi, hi, qi, ki: (bi, ki, 2 * n_hb + hi))
    o_spec = pl.BlockSpec((1, tq, hbd), lambda bi, hi, qi, ki: (bi, qi, hi))

    return pl.pallas_call(
        kernel,
        out_shape=jax.ShapeDtypeStruct((b, n, inner), qkv.dtype),
        grid=grid,
        in_specs=[q_spec, k_spec, v_spec],
        out_specs=o_spec,
        scratch_shapes=[
            pltpu.VMEM((hb, tq, 1), jnp.float32),   # running max  m
            pltpu.VMEM((hb, tq, 1), jnp.float32),   # running sum  l
            pltpu.VMEM((tq, hbd), jnp.float32),     # output accumulator
        ],
        compiler_params=pltpu.CompilerParams(
            dimension_semantics=("parallel", "parallel", "parallel", "arbitrary"),
            vmem_limit_bytes=32 * 1024 * 1024,
        ),
        cost_estimate=cost,
    )(qkv, qkv, qkv)


# ----------------------------------------------------------------------------
# Full module forward
# ----------------------------------------------------------------------------
def attention_forward(x, params, heads, dim_head):
    """Reproduces Attention.forward.  x: [b, n, dim] (f32)."""
    b, n, dim = x.shape
    inner_dim = heads * dim_head
    scale = dim_head ** (-0.5)
    project_out = not (heads == 1 and dim_head == dim)
    cdtype = jnp.bfloat16   # MXU compute dtype (f32 accumulation everywhere)

    # to_qkv: Linear(dim, 3*inner, bias=False) -- bf16 MXU matmul, bf16 activation
    x2 = x.reshape(b * n, dim).astype(cdtype)
    qkv = pallas_linear(x2, params["w_qkv"].astype(cdtype), out_dtype=cdtype)
    qkv = qkv.reshape(b, n, 3 * inner_dim)             # contiguous reshape

    # flash attention core (head split/merge handled by index_maps + slices)
    out = pallas_attention(qkv, heads, dim_head, scale)  # [b, n, inner] bf16
    # Dropout(p=0.0) is identity -- omitted.

    if not project_out:
        return out.astype(x.dtype)                       # Identity to_out

    y = pallas_linear(out.reshape(b * n, inner_dim),
                      params["w_out"].astype(cdtype),
                      params["b_out"],                   # bias added in f32
                      out_dtype=x.dtype)
    return y.reshape(b, n, dim)


# ----------------------------------------------------------------------------
# Pure-JAX f32 reference for a sanity check
# ----------------------------------------------------------------------------
def attention_reference(x, params, heads, dim_head):
    b, n, dim = x.shape
    inner_dim = heads * dim_head
    scale = dim_head ** (-0.5)
    qkv = x @ params["w_qkv"].T
    q, k, v = jnp.split(qkv, 3, axis=-1)
    sh = lambda t: t.reshape(b, n, heads, dim_head).transpose(0, 2, 1, 3)
    q, k, v = sh(q), sh(k), sh(v)
    dots = jnp.einsum("bhnd,bhmd->bhnm", q, k) * scale
    attn = jax.nn.softmax(dots, axis=-1)
    out = jnp.einsum("bhnm,bhmd->bhnd", attn, v)
    out = out.transpose(0, 2, 1, 3).reshape(b, n, inner_dim)
    return out @ params["w_out"].T + params["b_out"]


# ----------------------------------------------------------------------------
if __name__ == "__main__":
    # Small shapes consistent with the module defaults (heads=8, dim_head=64)
    batch, seq, dim = 2, 8, 32
    heads, dim_head = 8, 64
    inner_dim = heads * dim_head

    key = jax.random.PRNGKey(0)
    kx, kq, ko, kb = jax.random.split(key, 4)

    x = jax.random.normal(kx, (batch, seq, dim), dtype=jnp.float32)

    # Deterministic synthetic parameters (PyTorch Linear layout: [out, in]).
    params = {
        "w_qkv": jax.random.normal(kq, (3 * inner_dim, dim), jnp.float32) * 0.02,
        "w_out": jax.random.normal(ko, (dim, inner_dim), jnp.float32) * 0.02,
        "b_out": jax.random.normal(kb, (dim,), jnp.float32) * 0.02,
    }

    y = attention_forward(x, params, heads, dim_head)
    y = jax.block_until_ready(y)

    y_ref = attention_reference(x, params, heads, dim_head)
    assert y.shape == (batch, seq, dim)
    max_err = float(jnp.max(jnp.abs(y - y_ref)))
    # bf16 matmuls with f32 accumulation vs a pure-f32 reference.
    assert jnp.allclose(y, y_ref, atol=1e-2, rtol=2e-2), (
        f"mismatch vs reference (bf16 matmul path), max abs err {max_err:.3e}"
    )
    print("KERNEL_OK")
</pallas_src>

<mosaic_0001>
module attributes {stable_mosaic.version = 11 : i64} {
  func.func @_linear_kernel(%arg0: i32, %arg1: i32, %arg2: i32, %arg3: memref<16x128xbf16, #tpu.memory_space<vmem>>, %arg4: memref<512x128xbf16, #tpu.memory_space<vmem>>, %arg5: memref<16x512xbf16, #tpu.memory_space<vmem>>, %arg6: memref<16x512xf32, #tpu.memory_space<vmem>>) attributes {dimension_semantics = [#tpu.dimension_semantics<parallel>, #tpu.dimension_semantics<parallel>, #tpu.dimension_semantics<arbitrary>], iteration_bounds = array<i64: 1, 3, 1>, scalar_prefetch = 0 : i64, scratch_operands = 1 : i64, tpu.core_type = #tpu.core_type<tc>, window_params = [{transform_indices = @transform_0, window_bounds = array<i64: 16, 128>}, {transform_indices = @transform_1, window_bounds = array<i64: 512, 128>}, {transform_indices = @transform_2, window_bounds = array<i64: 16, 512>}]} {
    %c0_i32 = arith.constant 0 : i32
    %0 = arith.cmpi eq, %arg2, %c0_i32 : i32
    %1 = arith.extui %0 : i1 to i32
    %c0_i32_0 = arith.constant 0 : i32
    %2 = arith.cmpi ne, %1, %c0_i32_0 : i32
    scf.if %2 {
      %cst_10 = arith.constant 0.000000e+00 : f32
      %12 = vector.broadcast %cst_10 : f32 to vector<16x512xf32>
      %c0_11 = arith.constant 0 : index
      %c0_12 = arith.constant 0 : index
      %13 = vector.load %arg6[%c0_11, %c0_12] : memref<16x512xf32, #tpu.memory_space<vmem>>, vector<16x512xf32>
      tpu.vector_store %arg6[%c0_11, %c0_12], %12 {strides = array<i32>} : memref<16x512xf32, #tpu.memory_space<vmem>>, vector<16x512xf32>,
    } else {
    }
    %c0 = arith.constant 0 : index
    %c0_1 = arith.constant 0 : index
    %3 = vector.load %arg6[%c0, %c0_1] : memref<16x512xf32, #tpu.memory_space<vmem>>, vector<16x512xf32>
    %c0_2 = arith.constant 0 : index
    %c0_3 = arith.constant 0 : index
    %4 = vector.load %arg3[%c0_2, %c0_3] : memref<16x128xbf16, #tpu.memory_space<vmem>>, vector<16x128xbf16>
    %c0_4 = arith.constant 0 : index
    %c0_5 = arith.constant 0 : index
    %5 = vector.load %arg4[%c0_4, %c0_5] : memref<512x128xbf16, #tpu.memory_space<vmem>>, vector<512x128xbf16>
    %cst = arith.constant dense<0.000000e+00> : vector<16x512xf32>
    %6 = tpu.matmul %4, %5, %cst {dimension_numbers = #tpu.dot_dimension_numbers<[1], [1], [0], [0], [0, 0, 1, 0], [], []>} : vector<16x128xbf16>, vector<512x128xbf16>, vector<16x512xf32> -> vector<16x512xf32>
    %7 = arith.addf %3, %6 : vector<16x512xf32>
    %c0_6 = arith.constant 0 : index
    %c0_7 = arith.constant 0 : index
    %8 = vector.load %arg6[%c0_6, %c0_7] : memref<16x512xf32, #tpu.memory_space<vmem>>, vector<16x512xf32>
    tpu.vector_store %arg6[%c0_6, %c0_7], %7 {strides = array<i32>} : memref<16x512xf32, #tpu.memory_space<vmem>>, vector<16x512xf32>,
    %c0_i32_8 = arith.constant 0 : i32
    %9 = arith.cmpi eq, %arg2, %c0_i32_8 : i32
    %10 = arith.extui %9 : i1 to i32
    %c0_i32_9 = arith.constant 0 : i32
    %11 = arith.cmpi ne, %10, %c0_i32_9 : i32
    scf.if %11 {
      %c0_10 = arith.constant 0 : index
      %c0_11 = arith.constant 0 : index
      %12 = vector.load %arg6[%c0_10, %c0_11] : memref<16x512xf32, #tpu.memory_space<vmem>>, vector<16x512xf32>
      %13 = arith.truncf %12 : vector<16x512xf32> to vector<16x512xbf16>
      %c0_12 = arith.constant 0 : index
      %c0_13 = arith.constant 0 : index
      %14 = vector.load %arg5[%c0_12, %c0_13] : memref<16x512xbf16, #tpu.memory_space<vmem>>, vector<16x512xbf16>
      tpu.vector_store %arg5[%c0_12, %c0_13], %13 {strides = array<i32>} : memref<16x512xbf16, #tpu.memory_space<vmem>>, vector<16x512xbf16>,
    } else {
    }
    return
  }
  func.func @transform_0(%arg0: i32, %arg1: i32, %arg2: i32) -> (i32, i32) {
    %c0_i32 = arith.constant 0 : i32
    return %arg0, %arg2 : i32, i32
  }
  func.func @transform_1(%arg0: i32, %arg1: i32, %arg2: i32) -> (i32, i32) {
    %c0_i32 = arith.constant 0 : i32
    return %arg1, %arg2 : i32, i32
  }
  func.func @transform_2(%arg0: i32, %arg1: i32, %arg2: i32) -> (i32, i32) {
    %c0_i32 = arith.constant 0 : i32
    return %arg0, %arg1 : i32, i32
  }
}

</mosaic_0001>

<bundles_post_ra>
// kernel: tpu_custom_call.1
= control target key start
LH: loop header
LB: loop body
LE: loop exit
PB: predicated region body
PF: predicated region fallthrough
CT: control target
= control target key end

     0   :  { %7 = vsyncpa [#allocation4], 0  ;;  %s1354_s0 = inlined_call_operand.hbm [shape: bf16[16,128], index: 0, kind: input, shape index: {}]   ;;  %s1355_s1 = inlined_call_operand.hbm [shape: bf16[1536,128], index: 1, kind: input, shape index: {}]   ;;  %s1356_s2 = inlined_call_operand.hbm [shape: bf16[16,1536], index: 2, kind: output, shape index: {}]  }
   0x1   :  { %8 = vsyncpa [#allocation7], 0 }
   0x2   :  { %10 = vsyncpa [#allocation7 + $0x1], 0 }
   0x3   :  { %11 = vsyncpa [#allocation5], 0 }
   0x4   :  { %13 = vsyncpa [#allocation5 + $0x1], 0  ;;  %s1134_s9 = smov 0   ;;  %s1136_s10 = smov 0  }
   0x5   :  { %s1138_s11 = smov 0   ;;  %s1140_s12 = smov 0  }
   0x6   :  { %s1142_s13 = smov 0   ;;  %s1144_s14 = smov 0  }
   0x7 LB: > { %s764_s15 = sadd.s32 4294967295, %s1109_s14   ;;  %s765_s16 = sadd.s32 4294967294, %s1109_s14   ;;  %s1109_s14 = sphi %s1144_s14, %s19_s14   ;;  %s1105_s13 = sphi %s1142_s13, %s1375_s13   ;;  %s1101_s12 = sphi %s1140_s12, %s1374_s12   ;;  %s1097_s11 = sphi %s1138_s11, %s1373_s11   ;;  %s1093_s10 = sphi %s1136_s10, %s1372_s10   ;;  %s1089_s9 = sphi %s1134_s9, %s1371_s9  }
   0x8   : > { %p88_p0 = scmp.ne.s32.totalorder %s1093_s10, %s1089_s9  ;;  %p1168_p1 = scmp.eq.s32.totalorder %s764_s15, 0 }
   0x9   : > { %p1172_p2 = scmp.eq.s32.totalorder %s764_s15, 2  ;;  %p120_p3 = scmp.eq.s32.totalorder %s765_s16, 2 }
   0xa   : > { %p1178_p4 = por %p1168_p1, %p88_p0  ;;  %p766_p5 = scmp.ge.s32.totalorder %s1109_s14, 1 }
   0xb   : > { %p1183_p6 = por %p120_p3, %p88_p0  ;;  %p127_p7 = scmp.lt.s32.totalorder %s1109_s14, 4 }
   0xc   : > { %s1111_s22 = smov [#allocation3]   ;;  %s34_s25 = sadd.s32 1, %s1105_s13 }
   0xd   : > { %s1362_s20 = scalar_select %p1183_p6, 1, 0 }
   0xe   : > { %p1188_p8 = pnand %p766_p5, %p127_p7  ;;  %s143_s23 = sshll.u32 %s1111_s22, 4  ;;  %s144_s23 = int_to_ptr.vmem [resolvable:$true] %s143_s23 }
   0xf   : > { %s982_s26 = scalar_lea.vmem %s144_s23, 128  ;;  %p990_p3 = scmp.lt.s32.totalorder %s144_s23, %s144_s23 }
  0x10   : > { %p868_p9 = pneg %p1188_p8  ;;  %p983_p12 = scmp.ne.s32.totalorder %s144_s23, %s982_s26 }
  0x11   : > { %p991_p5 = scmp.lt.s32.totalorder %s982_s26, %s982_s26 }
  0x12   : > { %p1196_p10 = pnand %p868_p9, %p1168_p1 }
  0x13   : > { %p992_p7 = por %p991_p5, %p990_p3 }
  0x14   : > { %p973_p11 = pneg %p1196_p10 }
  0x16   : > { %p985_p13 = pnand %p983_p12, %p973_p11 }
  0x18   : > { %p986_p0 = pneg %p985_p13 }
  0x1a   : > { %p993_p6 = pnand %p992_p7, %p986_p0 }
  0x1c   : > { %996 = shalt.err (!%p993_p6)
}
  0x1d   : > { %s1357_s27 = smov 64   ;;  %s1113_s28 = smov 4  }
  0x1e   : > { %871 = dma.hbm_to_vmem [thread:$0]  (!%p1196_p10), %s1354_s0, 128, %s144_s23, [#allocation4], %s1357_s27, %s1357_s27, %s1113_s28  }
  0x1f   : > { %p36_p6 = scmp.ge.s32.totalorder %s34_s25, 3  ;;  %s75_s3 = sadd.s32 1, %s1097_s11 }
  0x20   : > { %p82_p9 = scmp.ne.s32.totalorder %s1097_s11, %s1093_s10  ;;  %p83_p11 = scmp.eq.s32.totalorder %s1109_s14, 0 }
  0x21   : > { %s1377_s25 = smov (%p36_p6, %s34_s25), 0  ;;  %p881_p0 = scmp.lt.s32.totalorder %s1109_s14, 3 }
  0x22   : > { %p1217_p12 = por %p83_p11, %p82_p9  ;;  %p1223_p13 = por %p1172_p2, %p82_p9 }
  0x23   : > { %s70_s6 = ssub.s32 %s1105_s13, %s1377_s25  ;;  %s157_s7 = sand.u32 1, %s1097_s11  }
  0x24   : > { %s1366_s5 = scalar_select %p1223_p13, 1, 0 }
  0x25   : > { %p73_p10 = scmp.eq.s32.totalorder %s70_s6, 0  ;;  %s769_s8 = sshll.u32 %s157_s7, 8 }
  0x26   : > { %s818_s16 = sshll.u32 %s1105_s13, 12  ;;  %s161_s26 = scalar_lea.vmem [#allocation6], %s769_s8 }
  0x27   : > { %s1232_s15 = scalar_select %p73_p10, %s1097_s11, %s75_s3  }
  0x28   : > { %s168_s24 = scalar_lea.hbm %s1355_s1, %s818_s16  ;;  %s169_s29 = sshll.u32 %s161_s26, 4  ;;  %s170_s29 = int_to_ptr.vmem [resolvable:$true] %s169_s29 }
  0x29   : > { %p1240_p2 = pnand %p881_p0, %p1217_p12  ;;  %s158_s30 = scalar_lea.sflag [#allocation7], %s157_s7 }
  0x2a   : > { %s1010_s6 = scalar_lea.vmem %s170_s29, 4096  ;;  %s1114_s3 = smov [#allocation6]  }
  0x2b   : > { %p999_p3 = pneg %p1240_p2  ;;  %p1011_p5 = scmp.ne.s32.totalorder %s170_s29, %s1010_s6 }
  0x2c   : > { %s1015_s27 = sshll.u32 %s1114_s3, 4  ;;  %s1016_s27 = int_to_ptr.vmem [resolvable:$false] %s1015_s27 }
  0x2d   : > { %p1013_p7 = pnand %p1011_p5, %p999_p3  ;;  %s1017_s16 = scalar_lea.vmem %s1016_s27, 8192 }
  0x2e   : > { %p1018_p9 = scmp.lt.s32.totalorder %s170_s29, %s1016_s27  ;;  %p1019_p11 = scmp.lt.s32.totalorder %s1017_s16, %s1010_s6 }
  0x2f   : > { %p1014_p6 = pneg %p1013_p7 }
  0x30   : > { %p1020_p10 = por %p1019_p11, %p1018_p9 }
  0x32   : > { %p1021_p13 = pnand %p1020_p10, %p1014_p6 }
  0x34   : > { %1024 = shalt.err (!%p1021_p13)
}
  0x35   : > { %s1368_s4 = smov 64   ;;  %181 = sbr.rel (%p1188_p8) target bundleno = 346 (0x15a), region = 28 }
  0x36   : > { %875 = dma.hbm_to_vmem [thread:$0]  (!%p1240_p2), %s168_s24, 4096, %s170_s29, %s158_s30, %s1368_s4, %s1368_s4, %s1113_s28  }
  0x3a   : > { %1076 = dma.done.wait (%p1168_p1), [#allocation4], 128  }
  0x3b   : > { %1078 = vsyncadd (%p1168_p1), [#allocation4], 4294967168  ;;  %s1258_s27 = sand.u32 1, %s1093_s10  }
  0x3c   : > { %s774_s7 = sshll.u32 %s1258_s27, 8  ;;  %s188_s8 = scalar_lea.sflag [#allocation7], %s1258_s27 }
  0x3d   : > { %s1262_s22 = scalar_lea.vmem [#allocation6], %s774_s7 }
  0x3e   : > { %1080 = dma.done.wait (%p1178_p4), %s188_s8, 4096  }
  0x3f   : > { %1082 = vsyncadd (%p1178_p4), %s188_s8, 4294963200  ;;  %v938_v0 = vld [vmem:[%s1262_s22 + $0x78] sm:$0xff]   ;;  %v942_v4 = vld [vmem:[%s1262_s22 + $0x70] sm:$0xff]   ;;  %s775_s17 = sshll.u32 %s1258_s27, 5  ;;  %s823_s28 = sshll.u32 %s1101_s12, 8 }
  0x40   : > { %v939_v1 = vld [vmem:[%s1262_s22 + $0xf8] sm:$0xff]   ;;  %824 = vmatprep.subr.bf16.mxu0 %v938_v0  ;;  %v943_v5 = vld [vmem:[%s1262_s22 + $0xf0] sm:$0xff]   ;;  %v946_v8 = vld [vmem:[%s1262_s22 + $0x68] sm:$0xff]   ;;  %s211_s19 = scalar_lea.vmem [#allocation8], %s775_s17  ;;  %s1307_s26 = scalar_lea.hbm %s1356_s2, %s823_s28 }
  0x41   : > { %v940_v2 = vld [vmem:[%s1262_s22 + $0x38] sm:$0xff]   ;;  %842 = vmatprep.subr.bf16.mxu1 %v939_v1  ;;  %v944_v6 = vld [vmem:[%s1262_s22 + $0x30] sm:$0xff]   ;;  %v947_v9 = vld [vmem:[%s1262_s22 + $0xe8] sm:$0xff]   ;;  %s659_s21 = sshll.u32 %s211_s19, 4  ;;  %s643_s12 = scalar_lea.sflag [#allocation5], %s1258_s27  ;;  %s1302_s21 = int_to_ptr.vmem [resolvable:$true] %s659_s21 }
  0x42   : > { %v941_v3 = vld [vmem:[%s1262_s22 + $0xb8] sm:$0xff]   ;;  %825 = vmatpush3.bf16.xpose.msra.mxu0 %v940_v2  ;;  %v945_v7 = vld [vmem:[%s1262_s22 + $0xb0] sm:$0xff]   ;;  %v948_v10 = vld [vmem:[%s1262_s22 + $0x28] sm:$0xff]   ;;  %s1025_s29 = scalar_lea.vmem %s1302_s21, 512  ;;  %p1369_p4 = scmp.ne.s32.totalorder %s1366_s5, 0 }
  0x43   : > { %843 = vmatpush3.bf16.xpose.msra.mxu1 %v941_v3  ;;  %826 = vmatprep.subr.bf16.mxu0 %v942_v4  ;;  %v949_v11 = vld [vmem:[%s1262_s22 + $0xa8] sm:$0xff]   ;;  %v950_v12 = vld [vmem:[%s1262_s22 + $0x60] sm:$0xff]   ;;  %v954_v16 = vld [vmem:[%s1262_s22 + $0x58] sm:$0xff]   ;;  %p1026_p1 = scmp.ne.s32.totalorder %s1302_s21, %s1025_s29  ;;  %s1115_s18 = smov [#allocation8]  }
  0x44   : > { %844 = vmatprep.subr.bf16.mxu1 %v943_v5  ;;  %v951_v13 = vld [vmem:[%s1262_s22 + $0xe0] sm:$0xff]   ;;  %v955_v17 = vld [vmem:[%s1262_s22 + $0xd8] sm:$0xff]   ;;  %v958_v21 = vld [vmem:[%s1262_s22 + $0x50] sm:$0xff]   ;;  %s1029_s30 = sshll.u32 %s1115_s18, 4  ;;  %s1030_s30 = int_to_ptr.vmem [resolvable:$false] %s1029_s30 }
  0x45   : > { %v952_v14 = vld [vmem:[%s1262_s22 + $0x20] sm:$0xff]   ;;  %v956_v18 = vld [vmem:[%s1262_s22 + $0x18] sm:$0xff]   ;;  %v959_v22 = vld [vmem:[%s1262_s22 + $0xd0] sm:$0xff]   ;;  %p1027_p8 = pnand %p1026_p1, %p1369_p4  ;;  %s1031_s6 = scalar_lea.vmem %s1030_s30, 1024 }
  0x46   : > { %v953_v15 = vld [vmem:[%s1262_s22 + $0xa0] sm:$0xff]   ;;  %v970_v19 = vld [vmem:[#allocation3] sm:$0xff]   ;;  %v960_v23 = vld [vmem:[%s1262_s22 + $0x10] sm:$0xff]   ;;  %p1032_p13 = scmp.lt.s32.totalorder %s1302_s21, %s1030_s30  ;;  %p1033_p0 = scmp.lt.s32.totalorder %s1031_s6, %s1025_s29 }
  0x47   : > { %v957_v20 = vld [vmem:[%s1262_s22 + $0x98] sm:$0xff]   ;;  %840 = vmatprep.mubr.bf16.mxu0 %v970_v19  ;;  %858 = vmatprep.mubr.bf16.mxu1 %v970_v19  ;;  %v961_v24 = vld [vmem:[%s1262_s22 + $0x90] sm:$0xff]   ;;  %v962_v25 = vld [vmem:[%s1262_s22 + $0x48] sm:$0xff]   ;;  %p1028_p12 = pneg %p1027_p8 }
  0x48   : > { %v963_v26 = vld [vmem:[%s1262_s22 + $0xc8] sm:$0xff]   ;;  %v966_v29 = vld [vmem:[%s1262_s22 + $0x40] sm:$0xff]   ;;  %p1034_p2 = por %p1033_p0, %p1032_p13 }
  0x49   : > { %v964_v27 = vld [vmem:[%s1262_s22 + $0x8] sm:$0xff]   ;;  %v967_v30 = vld [vmem:[%s1262_s22 + $0xc0] sm:$0xff]  }
  0x4a   : > { %827 = vmatpush3.bf16.xpose.msra.mxu0 %v944_v6  ;;  %v965_v28 = vld [vmem:[%s1262_s22 + $0x88] sm:$0xff]   ;;  %v968_v31 = vld [vmem:[%s1262_s22] sm:$0xff]   ;;  %p1035_p3 = pnand %p1034_p2, %p1028_p12 }
  0x4b   : > { %845 = vmatpush3.bf16.xpose.msra.mxu1 %v945_v7  ;;  %828 = vmatprep.subr.bf16.mxu0 %v946_v8  ;;  %v969_v32 = vld [vmem:[%s1262_s22 + $0x80] sm:$0xff]  }
  0x4c   : > { %846 = vmatprep.subr.bf16.mxu1 %v947_v9 }
  0x52   : > { %829 = vmatpush3.bf16.xpose.msra.mxu0 %v948_v10 }
  0x53   : > { %847 = vmatpush3.bf16.xpose.msra.mxu1 %v949_v11  ;;  %830 = vmatprep.subr.bf16.mxu0 %v950_v12 }
  0x54   : > { %848 = vmatprep.subr.bf16.mxu1 %v951_v13 }
  0x5a   : > { %831 = vmatpush3.bf16.xpose.msra.mxu0 %v952_v14 }
  0x5b   : > { %849 = vmatpush3.bf16.xpose.msra.mxu1 %v953_v15  ;;  %832 = vmatprep.subr.bf16.mxu0 %v954_v16 }
  0x5c   : > { %850 = vmatprep.subr.bf16.mxu1 %v955_v17 }
  0x62   : > { %833 = vmatpush3.bf16.xpose.msra.mxu0 %v956_v18 }
  0x63   : > { %851 = vmatpush3.bf16.xpose.msra.mxu1 %v957_v20  ;;  %834 = vmatprep.subr.bf16.mxu0 %v958_v21 }
  0x64   : > { %852 = vmatprep.subr.bf16.mxu1 %v959_v22 }
  0x6a   : > { %835 = vmatpush3.bf16.xpose.msra.mxu0 %v960_v23 }
  0x6b   : > { %853 = vmatpush3.bf16.xpose.msra.mxu1 %v961_v24  ;;  %836 = vmatprep.subr.bf16.mxu0 %v962_v25 }
  0x6c   : > { %854 = vmatprep.subr.bf16.mxu1 %v963_v26 }
  0x72   : > { %837 = vmatpush3.bf16.xpose.msra.mxu0 %v964_v27 }
  0x73   : > { %855 = vmatpush3.bf16.xpose.msra.mxu1 %v965_v28  ;;  %838 = vmatprep.subr.bf16.mxu0 %v966_v29 }
  0x74   : > { %856 = vmatprep.subr.bf16.mxu1 %v967_v30 }
  0x7a   : > { %839 = vmatpush3.bf16.xpose.msra.mxu0 %v968_v31 }
  0x7b   : > { %857 = vmatpush3.bf16.xpose.msra.mxu1 %v969_v32 }
  0x81   : > { %841 = vmatmul.mubr.bf16.vlgmr.msra.gmra.mxu0 %v970_v19 }
  0x82   : > { %859 = vmatmul.mubr.bf16.vlgmr.msra.gmra.mxu1 %v970_v19 }
 0x141   : > { %v535_v33 = vpop.f32.mrf.mxu0 }
 0x142   : > { %v578_v34 = vpop.f32.mrf.mxu1 }
 0x143   : > { %v537_v35 = vpop.f32.mrf.mxu0 }
 0x144   : > { %v819_v36 = vpack.c.bf16 %v537_v35, %v535_v33  ;;  %v580_v37 = vpop.f32.mrf.mxu1 }
 0x145   : > { %v820_v38 = vpack.c.bf16 %v580_v37, %v578_v34  ;;  %v539_v39 = vpop.f32.mrf.mxu0 }
 0x146   : > { %638 = vst [vmem:[%s211_s19] sm:$0xff] %v819_v36  ;;  %v582_v40 = vpop.f32.mrf.mxu1 }
 0x147   : > { %639 = vst [vmem:[%s211_s19 + $0x8] sm:$0xff] %v820_v38  ;;  %v541_v41 = vpop.f32.mrf.mxu0 }
 0x148   : > { %v821_v42 = vpack.c.bf16 %v541_v41, %v539_v39  ;;  %v584_v43 = vpop.f32.mrf.mxu1 }
 0x149   : > { %v822_v44 = vpack.c.bf16 %v584_v43, %v582_v40 }
 0x14a   : > { %640 = vst [vmem:[%s211_s19 + $0x10] sm:$0xff] %v821_v42 }
 0x14b   : > { %641 = vst [vmem:[%s211_s19 + $0x18] sm:$0xff] %v822_v44 }
 0x14c   : > { %1038 = shalt.err (!%p1035_p3)
}
 0x14d   : > { %s1039_s3 = scalar_lea.hbm %s1307_s26, 512  ;;  %s1043_s7 = scalar_lea.hbm %s1356_s2, 1536 }
 0x14e   : > { %p1040_p5 = scmp.ne.s32.totalorder %s1307_s26, %s1039_s3  ;;  %p1044_p9 = scmp.lt.s32.totalorder %s1307_s26, %s1356_s2 }
 0x14f   : > { %p1045_p11 = scmp.lt.s32.totalorder %s1043_s7, %s1039_s3 }
 0x150   : > { %p1041_p7 = pnand %p1040_p5, %p1369_p4 }
 0x151   : > { %p1046_p10 = por %p1045_p11, %p1044_p9 }
 0x152   : > { %p1042_p6 = pneg %p1041_p7 }
 0x154   : > { %p1047_p1 = pnand %p1046_p10, %p1042_p6 }
 0x156   : > { %1050 = shalt.err (!%p1047_p1)
}
 0x157   : > { %s1116_s17 = smov 256   ;;  %s1117_s19 = smov 768  }
 0x158   : > { %s1118_s28 = smov 16  }
 0x159   : > { %866 = dma.vmem_to_hbm [thread:$0]  (%p1369_p4), %s1302_s21, 512, %s1307_s26, %s643_s12, %s1116_s17, %s1117_s19, %s1118_s28  }
 0x15a PF: > { %p883_p8 = scmp.ge.s32.totalorder %s1109_s14, 2  ;;  %s674_s23 = sand.u32 1, %s1089_s9  }
 0x15b   : > { %p1370_p12 = scmp.ne.s32.totalorder %s1362_s20, 0  ;;  %s675_s24 = scalar_lea.sflag [#allocation5], %s674_s23 }
 0x15d   : > { %p877_p13 = pnand %p883_p8, %p1370_p12 }
 0x15f   : > { %p878_p0 = pneg %p877_p13 }
 0x161   : > { %1084 = dma.done.wait (%p878_p0), %s675_s24, 512  }
 0x162   : > { %1086 = vsyncadd (%p878_p0), %s675_s24, 4294966784  ;;  %s19_s14 = sadd.s32 1, %s1109_s14   ;;  %s1371_s9 = smov %s1093_s10 }
 0x163   : > { %p16_p2 = scmp.ge.s32.totalorder %s19_s14, 5   ;;  %s1372_s10 = smov %s1097_s11 }
 0x164   : > { %s1373_s11 = smov %s1232_s15  ;;  %s1374_s12 = smov %s1105_s13 }
 0x165   : > { %s1375_s13 = smov %s1377_s25  ;;  %18 = sbr.rel (!%p16_p2) target bundleno = 7 (0x7), region = 87 }
 0x16a   :  { %680 = vsyncpa [#allocation4], 1 }
 0x16b   :  { %682 = vsyncpa [#allocation4 + $0x1], 1 }
 0x16c   :  { %683 = vsyncpa [#allocation7], 1 }
 0x16d   :  { %685 = vsyncpa [#allocation7 + $0x1], 1 }
 0x16e   :  { %686 = vsyncpa [#allocation5], 1 }
 0x16f   :  { %688 = vsyncpa [#allocation5 + $0x1], 1 }

</bundles_post_ra>
